<compile_context>
chip_gen: v6e
topology: v6e:2x2x1
jax: 0.10.0
libtpu: 0.0.40
codegen_flags: <defaults>
</compile_context>

<pallas_src>
import jax
import jax.numpy as jnp
from jax.experimental import pallas as pl
from jax.experimental.pallas import tpu as pltpu


def lstm_fc_kernel(x_ref, wih_ref, whh_ref, b_ref, wfc_ref, bfc_ref, out_ref):
    """Fused LSTM + fc + sigmoid, single invocation.

    x_ref   : (S*B, IN)  all timesteps, seq-major, flattened
    wih_ref : (IN, 4H)   W_ih^T  (g-gate columns pre-scaled by 2)
    whh_ref : (H, 4H)    W_hh^T  (g-gate columns pre-scaled by 2)
    b_ref   : (1, 4H)    b_ih + b_hh (g-gate columns pre-scaled by 2)
    wfc_ref : (1, H)     fc weight (PyTorch layout, used as a lane vector)
    bfc_ref : (1,)       fc bias (SMEM scalar)
    out_ref : (B, 1)
    """
    B = out_ref.shape[0]
    H = whh_ref.shape[0]
    S = x_ref.shape[0] // B

    # One MXU pass for every timestep's input projection, bias folded in once.
    # Kept as a value (vregs), not a VMEM scratch.
    xg = jnp.dot(x_ref[...], wih_ref[...],
                 preferred_element_type=jnp.float32) + b_ref[...]

    # Load the recurrent weight once; the unrolled loop reuses the same value so the
    # MXU RHS push can stay hoisted across iterations.
    whh = whh_ref[...]

    h = jnp.zeros((B, H), jnp.float32)
    c = jnp.zeros((B, H), jnp.float32)

    # Fully static, fully unrolled recurrence (S is tiny); each xg slice is exactly one
    # (8,128) vreg and aligns to sublane-tile boundaries (B == 8).
    for t in range(S):
        # gates (B, 4H), PyTorch gate order i, f, g, o
        gates = xg[t * B:(t + 1) * B, :] + jnp.dot(
            h, whh, preferred_element_type=jnp.float32)

        # One full-width sigmoid covers i, f, o AND (because the g columns were
        # pre-scaled by 2 in the wrapper) the g-gate tanh: tanh(x) = 2*sigmoid(2x) - 1.
        sig = jax.nn.sigmoid(gates)
        i_g = sig[:, 0 * H:1 * H]
        f_g = sig[:, 1 * H:2 * H]
        g_g = 2.0 * sig[:, 2 * H:3 * H] - 1.0
        o_g = sig[:, 3 * H:4 * H]

        c = f_g * c + i_g * g_g
        h = o_g * jnp.tanh(c)

    # fc head with out_dim == 1: VPU multiply + XLU lane reduce instead of an MXU matmul.
    logits = jnp.sum(h * wfc_ref[...], axis=-1, keepdims=True) + bfc_ref[0]
    out_ref[...] = jax.nn.sigmoid(logits)


def network_forward(x, w_ih, w_hh, b_ih, b_hh, w_fc, b_fc):
    """x: (seq, batch, in_dim) float32.  Returns sigmoid(fc(lstm(x)[0][-1])), shape (batch, 1)."""
    S, B, IN = x.shape
    H = w_hh.shape[1]

    # Wrapper-side (free, XLA) layout prep: flatten timesteps, pre-transpose weights,
    # fold the two LSTM biases.
    x2d = x.reshape(S * B, IN).astype(jnp.float32)                  # (S*B, IN)
    wih_t = jnp.asarray(w_ih.T, jnp.float32)                        # (IN, 4H)
    whh_t = jnp.asarray(w_hh.T, jnp.float32)                        # (H, 4H)
    b = (b_ih + b_hh).reshape(1, 4 * H).astype(jnp.float32)         # (1, 4H)

    # Fold the g-gate tanh into the kernel's single full-width sigmoid:
    # tanh(x) = 2*sigmoid(2x) - 1, so scale the g-gate columns (2H:3H) by 2 here.
    gate_scale = jnp.concatenate(
        [jnp.ones((1, 2 * H), jnp.float32),
         jnp.full((1, H), 2.0, jnp.float32),
         jnp.ones((1, H), jnp.float32)], axis=1)                    # (1, 4H)
    wih_t = wih_t * gate_scale
    whh_t = whh_t * gate_scale
    b = b * gate_scale

    wfc = jnp.asarray(w_fc, jnp.float32).reshape(1, H)              # (1, H)
    bfc = jnp.asarray(b_fc, jnp.float32).reshape(1)                 # (1,)  -> SMEM scalar

    return pl.pallas_call(
        lstm_fc_kernel,
        out_shape=jax.ShapeDtypeStruct((B, 1), jnp.float32),
        in_specs=[
            pl.BlockSpec(memory_space=pltpu.MemorySpace.VMEM),      # x (all timesteps)
            pl.BlockSpec(memory_space=pltpu.MemorySpace.VMEM),      # W_ih^T (scaled)
            pl.BlockSpec(memory_space=pltpu.MemorySpace.VMEM),      # W_hh^T (scaled)
            pl.BlockSpec(memory_space=pltpu.MemorySpace.VMEM),      # b_ih + b_hh (scaled)
            pl.BlockSpec(memory_space=pltpu.MemorySpace.VMEM),      # W_fc (1, H)
            pl.BlockSpec(memory_space=pltpu.MemorySpace.SMEM),      # b_fc scalar
        ],
        out_specs=pl.BlockSpec(memory_space=pltpu.MemorySpace.VMEM),
    )(x2d, wih_t, whh_t, b, wfc, bfc)


def reference_forward(x, w_ih, w_hh, b_ih, b_hh, w_fc, b_fc):
    """Pure-JAX reference of the same forward pass (for sanity checking)."""
    S, B, IN = x.shape
    H = w_hh.shape[1]
    h = jnp.zeros((B, H), jnp.float32)
    c = jnp.zeros((B, H), jnp.float32)
    for t in range(S):
        gates = x[t] @ w_ih.T + h @ w_hh.T + b_ih + b_hh
        i = jax.nn.sigmoid(gates[:, 0 * H:1 * H])
        f = jax.nn.sigmoid(gates[:, 1 * H:2 * H])
        g = jnp.tanh(gates[:, 2 * H:3 * H])
        o = jax.nn.sigmoid(gates[:, 3 * H:4 * H])
        c = f * c + i * g
        h = o * jnp.tanh(c)
    return jax.nn.sigmoid(h @ w_fc.T + b_fc)


if __name__ == "__main__":
    # Small shapes consistent with the module: seq=8, batch=8, in_dim=4, hid_dim=32
    S, B, IN, H = 8, 8, 4, 32

    key = jax.random.PRNGKey(0)
    ks = jax.random.split(key, 7)
    bound = 1.0 / jnp.sqrt(jnp.float32(H))   # PyTorch LSTM/Linear default uniform bound

    x = jax.random.normal(ks[0], (S, B, IN), dtype=jnp.float32)
    w_ih = jax.random.uniform(ks[1], (4 * H, IN), jnp.float32, -bound, bound)
    w_hh = jax.random.uniform(ks[2], (4 * H, H), jnp.float32, -bound, bound)
    b_ih = jax.random.uniform(ks[3], (4 * H,), jnp.float32, -bound, bound)
    b_hh = jax.random.uniform(ks[4], (4 * H,), jnp.float32, -bound, bound)
    w_fc = jax.random.uniform(ks[5], (1, H), jnp.float32, -bound, bound)
    b_fc = jax.random.uniform(ks[6], (1,), jnp.float32, -bound, bound)

    out = network_forward(x, w_ih, w_hh, b_ih, b_hh, w_fc, b_fc)
    out = jax.block_until_ready(out)

    ref = reference_forward(x, w_ih, w_hh, b_ih, b_hh, w_fc, b_fc)
    assert out.shape == (B, 1)
    assert jnp.max(jnp.abs(out - ref)) < 1e-5

    print("KERNEL_OK")
</pallas_src>

<mosaic_0001>
module attributes {stable_mosaic.version = 11 : i64} {
  func.func @lstm_fc_kernel(%arg0: memref<64x4xf32, #tpu.memory_space<vmem>>, %arg1: memref<4x128xf32, #tpu.memory_space<vmem>>, %arg2: memref<32x128xf32, #tpu.memory_space<vmem>>, %arg3: memref<1x128xf32, #tpu.memory_space<vmem>>, %arg4: memref<1x32xf32, #tpu.memory_space<vmem>>, %arg5: memref<1xf32, #tpu.memory_space<smem>>, %arg6: memref<8x1xf32, #tpu.memory_space<vmem>>) attributes {dimension_semantics = [], scalar_prefetch = 0 : i64, scratch_operands = 0 : i64, tpu.core_type = #tpu.core_type<tc>} {
    %c0 = arith.constant 0 : index
    %c0_0 = arith.constant 0 : index
    %0 = vector.load %arg0[%c0, %c0_0] : memref<64x4xf32, #tpu.memory_space<vmem>>, vector<64x4xf32>
    %c0_1 = arith.constant 0 : index
    %c0_2 = arith.constant 0 : index
    %1 = vector.load %arg1[%c0_1, %c0_2] : memref<4x128xf32, #tpu.memory_space<vmem>>, vector<4x128xf32>
    %cst = arith.constant dense<0.000000e+00> : vector<64x128xf32>
    %2 = tpu.matmul %0, %1, %cst {dimension_numbers = #tpu.dot_dimension_numbers<[1], [0], [0], [1], [0, 0, 1, 1], [], []>} : vector<64x4xf32>, vector<4x128xf32>, vector<64x128xf32> -> vector<64x128xf32>
    %c0_3 = arith.constant 0 : index
    %c0_4 = arith.constant 0 : index
    %3 = vector.load %arg3[%c0_3, %c0_4] : memref<1x128xf32, #tpu.memory_space<vmem>>, vector<1x128xf32>
    %4 = vector.broadcast %3 : vector<1x128xf32> to vector<64x128xf32>
    %5 = arith.addf %2, %4 : vector<64x128xf32>
    %c0_5 = arith.constant 0 : index
    %c0_6 = arith.constant 0 : index
    %6 = vector.load %arg2[%c0_5, %c0_6] : memref<32x128xf32, #tpu.memory_space<vmem>>, vector<32x128xf32>
    %cst_7 = arith.constant 0.000000e+00 : f32
    %7 = vector.broadcast %cst_7 : f32 to vector<8x32xf32>
    %cst_8 = arith.constant 0.000000e+00 : f32
    %8 = vector.broadcast %cst_8 : f32 to vector<8x32xf32>
    %9 = vector.extract_strided_slice %5 {offsets = [0, 0], sizes = [8, 128], strides = [1, 1]} : vector<64x128xf32> to vector<8x128xf32>
    %cst_9 = arith.constant dense<0.000000e+00> : vector<8x128xf32>
    %10 = tpu.matmul %7, %6, %cst_9 {dimension_numbers = #tpu.dot_dimension_numbers<[1], [0], [0], [1], [0, 0, 1, 1], [], []>} : vector<8x32xf32>, vector<32x128xf32>, vector<8x128xf32> -> vector<8x128xf32>
    %11 = arith.addf %9, %10 : vector<8x128xf32>
    %12 = arith.negf %11 : vector<8x128xf32>
    %13 = math.exp %12 : vector<8x128xf32>
    %cst_10 = arith.constant 1.000000e+00 : f32
    %14 = vector.broadcast %cst_10 : f32 to vector<8x128xf32>
    %15 = arith.addf %14, %13 : vector<8x128xf32>
    %16 = arith.divf %14, %15 : vector<8x128xf32>
    %17 = vector.extract_strided_slice %16 {offsets = [0, 0], sizes = [8, 32], strides = [1, 1]} : vector<8x128xf32> to vector<8x32xf32>
    %18 = vector.extract_strided_slice %16 {offsets = [0, 32], sizes = [8, 32], strides = [1, 1]} : vector<8x128xf32> to vector<8x32xf32>
    %19 = vector.extract_strided_slice %16 {offsets = [0, 64], sizes = [8, 32], strides = [1, 1]} : vector<8x128xf32> to vector<8x32xf32>
    %cst_11 = arith.constant 2.000000e+00 : f32
    %20 = vector.broadcast %cst_11 : f32 to vector<8x32xf32>
    %21 = arith.mulf %20, %19 : vector<8x32xf32>
    %cst_12 = arith.constant 1.000000e+00 : f32
    %22 = vector.broadcast %cst_12 : f32 to vector<8x32xf32>
    %23 = arith.subf %21, %22 : vector<8x32xf32>
    %24 = vector.extract_strided_slice %16 {offsets = [0, 96], sizes = [8, 32], strides = [1, 1]} : vector<8x128xf32> to vector<8x32xf32>
    %25 = arith.mulf %18, %8 : vector<8x32xf32>
    %26 = arith.mulf %17, %23 : vector<8x32xf32>
    %27 = arith.addf %25, %26 : vector<8x32xf32>
    %28 = math.tanh %27 : vector<8x32xf32>
    %29 = arith.mulf %24, %28 : vector<8x32xf32>
    %30 = vector.extract_strided_slice %5 {offsets = [8, 0], sizes = [8, 128], strides = [1, 1]} : vector<64x128xf32> to vector<8x128xf32>
    %cst_13 = arith.constant dense<0.000000e+00> : vector<8x128xf32>
    %31 = tpu.matmul %29, %6, %cst_13 {dimension_numbers = #tpu.dot_dimension_numbers<[1], [0], [0], [1], [0, 0, 1, 1], [], []>} : vector<8x32xf32>, vector<32x128xf32>, vector<8x128xf32> -> vector<8x128xf32>
    %32 = arith.addf %30, %31 : vector<8x128xf32>
    %33 = arith.negf %32 : vector<8x128xf32>
    %34 = math.exp %33 : vector<8x128xf32>
    %cst_14 = arith.constant 1.000000e+00 : f32
    %35 = vector.broadcast %cst_14 : f32 to vector<8x128xf32>
    %36 = arith.addf %35, %34 : vector<8x128xf32>
    %37 = arith.divf %35, %36 : vector<8x128xf32>
    %38 = vector.extract_strided_slice %37 {offsets = [0, 0], sizes = [8, 32], strides = [1, 1]} : vector<8x128xf32> to vector<8x32xf32>
    %39 = vector.extract_strided_slice %37 {offsets = [0, 32], sizes = [8, 32], strides = [1, 1]} : vector<8x128xf32> to vector<8x32xf32>
    %40 = vector.extract_strided_slice %37 {offsets = [0, 64], sizes = [8, 32], strides = [1, 1]} : vector<8x128xf32> to vector<8x32xf32>
    %cst_15 = arith.constant 2.000000e+00 : f32
    %41 = vector.broadcast %cst_15 : f32 to vector<8x32xf32>
    %42 = arith.mulf %41, %40 : vector<8x32xf32>
    %cst_16 = arith.constant 1.000000e+00 : f32
    %43 = vector.broadcast %cst_16 : f32 to vector<8x32xf32>
    %44 = arith.subf %42, %43 : vector<8x32xf32>
    %45 = vector.extract_strided_slice %37 {offsets = [0, 96], sizes = [8, 32], strides = [1, 1]} : vector<8x128xf32> to vector<8x32xf32>
    %46 = arith.mulf %39, %27 : vector<8x32xf32>
    %47 = arith.mulf %38, %44 : vector<8x32xf32>
    %48 = arith.addf %46, %47 : vector<8x32xf32>
    %49 = math.tanh %48 : vector<8x32xf32>
    %50 = arith.mulf %45, %49 : vector<8x32xf32>
    %51 = vector.extract_strided_slice %5 {offsets = [16, 0], sizes = [8, 128], strides = [1, 1]} : vector<64x128xf32> to vector<8x128xf32>
    %cst_17 = arith.constant dense<0.000000e+00> : vector<8x128xf32>
    %52 = tpu.matmul %50, %6, %cst_17 {dimension_numbers = #tpu.dot_dimension_numbers<[1], [0], [0], [1], [0, 0, 1, 1], [], []>} : vector<8x32xf32>, vector<32x128xf32>, vector<8x128xf32> -> vector<8x128xf32>
    %53 = arith.addf %51, %52 : vector<8x128xf32>
    %54 = arith.negf %53 : vector<8x128xf32>
    %55 = math.exp %54 : vector<8x128xf32>
    %cst_18 = arith.constant 1.000000e+00 : f32
    %56 = vector.broadcast %cst_18 : f32 to vector<8x128xf32>
    %57 = arith.addf %56, %55 : vector<8x128xf32>
    %58 = arith.divf %56, %57 : vector<8x128xf32>
    %59 = vector.extract_strided_slice %58 {offsets = [0, 0], sizes = [8, 32], strides = [1, 1]} : vector<8x128xf32> to vector<8x32xf32>
    %60 = vector.extract_strided_slice %58 {offsets = [0, 32], sizes = [8, 32], strides = [1, 1]} : vector<8x128xf32> to vector<8x32xf32>
    %61 = vector.extract_strided_slice %58 {offsets = [0, 64], sizes = [8, 32], strides = [1, 1]} : vector<8x128xf32> to vector<8x32xf32>
    %cst_19 = arith.constant 2.000000e+00 : f32
    %62 = vector.broadcast %cst_19 : f32 to vector<8x32xf32>
    %63 = arith.mulf %62, %61 : vector<8x32xf32>
    %cst_20 = arith.constant 1.000000e+00 : f32
    %64 = vector.broadcast %cst_20 : f32 to vector<8x32xf32>
    %65 = arith.subf %63, %64 : vector<8x32xf32>
    %66 = vector.extract_strided_slice %58 {offsets = [0, 96], sizes = [8, 32], strides = [1, 1]} : vector<8x128xf32> to vector<8x32xf32>
    %67 = arith.mulf %60, %48 : vector<8x32xf32>
    %68 = arith.mulf %59, %65 : vector<8x32xf32>
    %69 = arith.addf %67, %68 : vector<8x32xf32>
    %70 = math.tanh %69 : vector<8x32xf32>
    %71 = arith.mulf %66, %70 : vector<8x32xf32>
    %72 = vector.extract_strided_slice %5 {offsets = [24, 0], sizes = [8, 128], strides = [1, 1]} : vector<64x128xf32> to vector<8x128xf32>
    %cst_21 = arith.constant dense<0.000000e+00> : vector<8x128xf32>
    %73 = tpu.matmul %71, %6, %cst_21 {dimension_numbers = #tpu.dot_dimension_numbers<[1], [0], [0], [1], [0, 0, 1, 1], [], []>} : vector<8x32xf32>, vector<32x128xf32>, vector<8x128xf32> -> vector<8x128xf32>
    %74 = arith.addf %72, %73 : vector<8x128xf32>
    %75 = arith.negf %74 : vector<8x128xf32>
    %76 = math.exp %75 : vector<8x128xf32>
    %cst_22 = arith.constant 1.000000e+00 : f32
    %77 = vector.broadcast %cst_22 : f32 to vector<8x128xf32>
    %78 = arith.addf %77, %76 : vector<8x128xf32>
    %79 = arith.divf %77, %78 : vector<8x128xf32>
    %80 = vector.extract_strided_slice %79 {offsets = [0, 0], sizes = [8, 32], strides = [1, 1]} : vector<8x128xf32> to vector<8x32xf32>
    %81 = vector.extract_strided_slice %79 {offsets = [0, 32], sizes = [8, 32], strides = [1, 1]} : vector<8x128xf32> to vector<8x32xf32>
    %82 = vector.extract_strided_slice %79 {offsets = [0, 64], sizes = [8, 32], strides = [1, 1]} : vector<8x128xf32> to vector<8x32xf32>
    %cst_23 = arith.constant 2.000000e+00 : f32
    %83 = vector.broadcast %cst_23 : f32 to vector<8x32xf32>
    %84 = arith.mulf %83, %82 : vector<8x32xf32>
    %cst_24 = arith.constant 1.000000e+00 : f32
    %85 = vector.broadcast %cst_24 : f32 to vector<8x32xf32>
    %86 = arith.subf %84, %85 : vector<8x32xf32>
    %87 = vector.extract_strided_slice %79 {offsets = [0, 96], sizes = [8, 32], strides = [1, 1]} : vector<8x128xf32> to vector<8x32xf32>
    %88 = arith.mulf %81, %69 : vector<8x32xf32>
    %89 = arith.mulf %80, %86 : vector<8x32xf32>
    %90 = arith.addf %88, %89 : vector<8x32xf32>
    %91 = math.tanh %90 : vector<8x32xf32>
    %92 = arith.mulf %87, %91 : vector<8x32xf32>
    %93 = vector.extract_strided_slice %5 {offsets = [32, 0], sizes = [8, 128], strides = [1, 1]} : vector<64x128xf32> to vector<8x128xf32>
    %cst_25 = arith.constant dense<0.000000e+00> : vector<8x128xf32>
    %94 = tpu.matmul %92, %6, %cst_25 {dimension_numbers = #tpu.dot_dimension_numbers<[1], [0], [0], [1], [0, 0, 1, 1], [], []>} : vector<8x32xf32>, vector<32x128xf32>, vector<8x128xf32> -> vector<8x128xf32>
    %95 = arith.addf %93, %94 : vector<8x128xf32>
    %96 = arith.negf %95 : vector<8x128xf32>
    %97 = math.exp %96 : vector<8x128xf32>
    %cst_26 = arith.constant 1.000000e+00 : f32
    %98 = vector.broadcast %cst_26 : f32 to vector<8x128xf32>
    %99 = arith.addf %98, %97 : vector<8x128xf32>
    %100 = arith.divf %98, %99 : vector<8x128xf32>
    %101 = vector.extract_strided_slice %100 {offsets = [0, 0], sizes = [8, 32], strides = [1, 1]} : vector<8x128xf32> to vector<8x32xf32>
    %102 = vector.extract_strided_slice %100 {offsets = [0, 32], sizes = [8, 32], strides = [1, 1]} : vector<8x128xf32> to vector<8x32xf32>
    %103 = vector.extract_strided_slice %100 {offsets = [0, 64], sizes = [8, 32], strides = [1, 1]} : vector<8x128xf32> to vector<8x32xf32>
    %cst_27 = arith.constant 2.000000e+00 : f32
    %104 = vector.broadcast %cst_27 : f32 to vector<8x32xf32>
    %105 = arith.mulf %104, %103 : vector<8x32xf32>
    %cst_28 = arith.constant 1.000000e+00 : f32
    %106 = vector.broadcast %cst_28 : f32 to vector<8x32xf32>
    %107 = arith.subf %105, %106 : vector<8x32xf32>
    %108 = vector.extract_strided_slice %100 {offsets = [0, 96], sizes = [8, 32], strides = [1, 1]} : vector<8x128xf32> to vector<8x32xf32>
    %109 = arith.mulf %102, %90 : vector<8x32xf32>
    %110 = arith.mulf %101, %107 : vector<8x32xf32>
    %111 = arith.addf %109, %110 : vector<8x32xf32>
    %112 = math.tanh %111 : vector<8x32xf32>
    %113 = arith.mulf %108, %112 : vector<8x32xf32>
    %114 = vector.extract_strided_slice %5 {offsets = [40, 0], sizes = [8, 128], strides = [1, 1]} : vector<64x128xf32> to vector<8x128xf32>
    %cst_29 = arith.constant dense<0.000000e+00> : vector<8x128xf32>
    %115 = tpu.matmul %113, %6, %cst_29 {dimension_numbers = #tpu.dot_dimension_numbers<[1], [0], [0], [1], [0, 0, 1, 1], [], []>} : vector<8x32xf32>, vector<32x128xf32>, vector<8x128xf32> -> vector<8x128xf32>
    %116 = arith.addf %114, %115 : vector<8x128xf32>
    %117 = arith.negf %116 : vector<8x128xf32>
    %118 = math.exp %117 : vector<8x128xf32>
    %cst_30 = arith.constant 1.000000e+00 : f32
    %119 = vector.broadcast %cst_30 : f32 to vector<8x128xf32>
    %120 = arith.addf %119, %118 : vector<8x128xf32>
    %121 = arith.divf %119, %120 : vector<8x128xf32>
    %122 = vector.extract_strided_slice %121 {offsets = [0, 0], sizes = [8, 32], strides = [1, 1]} : vector<8x128xf32> to vector<8x32xf32>
    %123 = vector.extract_strided_slice %121 {offsets = [0, 32], sizes = [8, 32], strides = [1, 1]} : vector<8x128xf32> to vector<8x32xf32>
    %124 = vector.extract_strided_slice %121 {offsets = [0, 64], sizes = [8, 32], strides = [1, 1]} : vector<8x128xf32> to vector<8x32xf32>
    %cst_31 = arith.constant 2.000000e+00 : f32
    %125 = vector.broadcast %cst_31 : f32 to vector<8x32xf32>
    %126 = arith.mulf %125, %124 : vector<8x32xf32>
    %cst_32 = arith.constant 1.000000e+00 : f32
    %127 = vector.broadcast %cst_32 : f32 to vector<8x32xf32>
    %128 = arith.subf %126, %127 : vector<8x32xf32>
    %129 = vector.extract_strided_slice %121 {offsets = [0, 96], sizes = [8, 32], strides = [1, 1]} : vector<8x128xf32> to vector<8x32xf32>
    %130 = arith.mulf %123, %111 : vector<8x32xf32>
    %131 = arith.mulf %122, %128 : vector<8x32xf32>
    %132 = arith.addf %130, %131 : vector<8x32xf32>
    %133 = math.tanh %132 : vector<8x32xf32>
    %134 = arith.mulf %129, %133 : vector<8x32xf32>
    %135 = vector.extract_strided_slice %5 {offsets = [48, 0], sizes = [8, 128], strides = [1, 1]} : vector<64x128xf32> to vector<8x128xf32>
    %cst_33 = arith.constant dense<0.000000e+00> : vector<8x128xf32>
    %136 = tpu.matmul %134, %6, %cst_33 {dimension_numbers = #tpu.dot_dimension_numbers<[1], [0], [0], [1], [0, 0, 1, 1], [], []>} : vector<8x32xf32>, vector<32x128xf32>, vector<8x128xf32> -> vector<8x128xf32>
    %137 = arith.addf %135, %136 : vector<8x128xf32>
    %138 = arith.negf %137 : vector<8x128xf32>
    %139 = math.exp %138 : vector<8x128xf32>
    %cst_34 = arith.constant 1.000000e+00 : f32
    %140 = vector.broadcast %cst_34 : f32 to vector<8x128xf32>
    %141 = arith.addf %140, %139 : vector<8x128xf32>
    %142 = arith.divf %140, %141 : vector<8x128xf32>
    %143 = vector.extract_strided_slice %142 {offsets = [0, 0], sizes = [8, 32], strides = [1, 1]} : vector<8x128xf32> to vector<8x32xf32>
    %144 = vector.extract_strided_slice %142 {offsets = [0, 32], sizes = [8, 32], strides = [1, 1]} : vector<8x128xf32> to vector<8x32xf32>
    %145 = vector.extract_strided_slice %142 {offsets = [0, 64], sizes = [8, 32], strides = [1, 1]} : vector<8x128xf32> to vector<8x32xf32>
    %cst_35 = arith.constant 2.000000e+00 : f32
    %146 = vector.broadcast %cst_35 : f32 to vector<8x32xf32>
    %147 = arith.mulf %146, %145 : vector<8x32xf32>
    %cst_36 = arith.constant 1.000000e+00 : f32
    %148 = vector.broadcast %cst_36 : f32 to vector<8x32xf32>
    %149 = arith.subf %147, %148 : vector<8x32xf32>
    %150 = vector.extract_strided_slice %142 {offsets = [0, 96], sizes = [8, 32], strides = [1, 1]} : vector<8x128xf32> to vector<8x32xf32>
    %151 = arith.mulf %144, %132 : vector<8x32xf32>
    %152 = arith.mulf %143, %149 : vector<8x32xf32>
    %153 = arith.addf %151, %152 : vector<8x32xf32>
    %154 = math.tanh %153 : vector<8x32xf32>
    %155 = arith.mulf %150, %154 : vector<8x32xf32>
    %156 = vector.extract_strided_slice %5 {offsets = [56, 0], sizes = [8, 128], strides = [1, 1]} : vector<64x128xf32> to vector<8x128xf32>
    %cst_37 = arith.constant dense<0.000000e+00> : vector<8x128xf32>
    %157 = tpu.matmul %155, %6, %cst_37 {dimension_numbers = #tpu.dot_dimension_numbers<[1], [0], [0], [1], [0, 0, 1, 1], [], []>} : vector<8x32xf32>, vector<32x128xf32>, vector<8x128xf32> -> vector<8x128xf32>
    %158 = arith.addf %156, %157 : vector<8x128xf32>
    %159 = arith.negf %158 : vector<8x128xf32>
    %160 = math.exp %159 : vector<8x128xf32>
    %cst_38 = arith.constant 1.000000e+00 : f32
    %161 = vector.broadcast %cst_38 : f32 to vector<8x128xf32>
    %162 = arith.addf %161, %160 : vector<8x128xf32>
    %163 = arith.divf %161, %162 : vector<8x128xf32>
    %164 = vector.extract_strided_slice %163 {offsets = [0, 0], sizes = [8, 32], strides = [1, 1]} : vector<8x128xf32> to vector<8x32xf32>
    %165 = vector.extract_strided_slice %163 {offsets = [0, 32], sizes = [8, 32], strides = [1, 1]} : vector<8x128xf32> to vector<8x32xf32>
    %166 = vector.extract_strided_slice %163 {offsets = [0, 64], sizes = [8, 32], strides = [1, 1]} : vector<8x128xf32> to vector<8x32xf32>
    %cst_39 = arith.constant 2.000000e+00 : f32
    %167 = vector.broadcast %cst_39 : f32 to vector<8x32xf32>
    %168 = arith.mulf %167, %166 : vector<8x32xf32>
    %cst_40 = arith.constant 1.000000e+00 : f32
    %169 = vector.broadcast %cst_40 : f32 to vector<8x32xf32>
    %170 = arith.subf %168, %169 : vector<8x32xf32>
    %171 = vector.extract_strided_slice %163 {offsets = [0, 96], sizes = [8, 32], strides = [1, 1]} : vector<8x128xf32> to vector<8x32xf32>
    %172 = arith.mulf %165, %153 : vector<8x32xf32>
    %173 = arith.mulf %164, %170 : vector<8x32xf32>
    %174 = arith.addf %172, %173 : vector<8x32xf32>
    %175 = math.tanh %174 : vector<8x32xf32>
    %176 = arith.mulf %171, %175 : vector<8x32xf32>
    %c0_41 = arith.constant 0 : index
    %c0_42 = arith.constant 0 : index
    %177 = vector.load %arg4[%c0_41, %c0_42] : memref<1x32xf32, #tpu.memory_space<vmem>>, vector<1x32xf32>
    %178 = vector.broadcast %177 : vector<1x32xf32> to vector<8x32xf32>
    %179 = arith.mulf %176, %178 : vector<8x32xf32>
    %cst_43 = arith.constant dense<0.000000e+00> : vector<8xf32>
    %180 = vector.multi_reduction <add>, %179, %cst_43 [1] : vector<8x32xf32> to vector<8xf32>
    %181 = vector.shape_cast %180 : vector<8xf32> to vector<8x1xf32>
    %c0_44 = arith.constant 0 : index
    %182 = memref.load %arg5[%c0_44] : memref<1xf32, #tpu.memory_space<smem>>
    %183 = vector.broadcast %182 : f32 to vector<8x1xf32>
    %184 = arith.addf %181, %183 : vector<8x1xf32>
    %185 = arith.negf %184 : vector<8x1xf32>
    %186 = math.exp %185 : vector<8x1xf32>
    %cst_45 = arith.constant 1.000000e+00 : f32
    %187 = vector.broadcast %cst_45 : f32 to vector<8x1xf32>
    %188 = arith.addf %187, %186 : vector<8x1xf32>
    %189 = arith.divf %187, %188 : vector<8x1xf32>
    %c0_46 = arith.constant 0 : index
    %c0_47 = arith.constant 0 : index
    %190 = vector.load %arg6[%c0_46, %c0_47] : memref<8x1xf32, #tpu.memory_space<vmem>>, vector<8x1xf32>
    tpu.vector_store %arg6[%c0_46, %c0_47], %189 {strides = array<i32>} : memref<8x1xf32, #tpu.memory_space<vmem>>, vector<8x1xf32>,
    return
  }
}

</mosaic_0001>

<bundles_post_ra>
// kernel: tpu_custom_call.1
= control target key start
LH: loop header
LB: loop body
LE: loop exit
PB: predicated region body
PF: predicated region fallthrough
CT: control target
= control target key end

     0   :  { %vm65_vm0 = vcmask 1043456   ;;  %vm40_vm1 = vcmask 31744   ;;  %v1260_v0 = vmov 0.0   ;;  %vm1261_vm2 = vmmov 0   ;;  %s1262_s11 = smov 64   ;;  %s1264_s25 = smov 96   ;;  %s1510_s1 = inlined_call_operand.vmem [shape: f32[4,128], index: 1, kind: input, shape index: {}]   ;;  %s1511_s2 = inlined_call_operand.vmem [shape: f32[32,128], index: 2, kind: input, shape index: {}]   ;;  %s1512_s0 = inlined_call_operand.vmem [shape: f32[64,4], index: 0, kind: input, shape index: {}]   ;;  %s1513_s3 = inlined_call_operand.vmem [shape: f32[1,128], index: 3, kind: input, shape index: {}]   ;;  %s1514_s4 = inlined_call_operand.vmem [shape: f32[1,32], index: 4, kind: input, shape index: {}]   ;;  %s1515_s5 = inlined_call_operand.<no memory space> [shape: f32[1], index: 5, kind: input, shape index: {}]   ;;  %s1516_s6 = inlined_call_operand.vmem [shape: f32[8,1], index: 6, kind: output, shape index: {}]  }
   0x1   :  { %1115 = vmatprep.subr.mxu1 %v1260_v0  ;;  %v32_v1 = vld [vmem:[%s1510_s1] sm:$0xf]  ;;  %v1307_v2 = vld [vmem:[%s1511_s2 + $0x18] sm:$0xff]  ;;  %1123 = vmatprep.mubr.msk.f32.mxu1 %vm1261_vm2, %v1260_v0  ;;  %v25_v4 = vld [vmem:[%s1512_s0 + $0x8] sm:$0xff]  ;;  %vm178_vm3 = vcmask 261120   ;;  %vm1011_vm4 = vcmask 7168  }
   0x2   :  { %v24_v3 = vld [vmem:[%s1512_s0] sm:$0xff]  ;;  %1101 = vmatprep.subr.msk.mxu0 %vm65_vm0, %v32_v1  ;;  %1116 = vmatpush3.msra.mxu1 %v1307_v2  ;;  %v1321_v5 = vld [vmem:[%s1511_s2 + $0x10] sm:$0xff]  ;;  %v1329_v6 = vld [vmem:[%s1511_s2 + $0x8] sm:$0xff] }
   0x3   :  { %1102 = vmatpush3.msk.msra.mxu0 %vm65_vm0, %v32_v1  ;;  %1103 = vmatprep.mubr.msk.f32.mxu0 %vm40_vm1, %v24_v3  ;;  %v1337_v7 = vld [vmem:[%s1511_s2] sm:$0xff]  ;;  %v26_v45 = vld [vmem:[%s1512_s0 + $0x10] sm:$0xff]  ;;  %v27_v46 = vld [vmem:[%s1512_s0 + $0x18] sm:$0xff] }
   0x4   :  { %1117 = vmatprep.subr.mxu1 %v1260_v0  ;;  %1104 = vmatmul.mubr.msk.f32.vlgmr.msra.gmra.mxu0 %vm40_vm1, %v25_v4  ;;  %v1365_v9 = vld [vmem:[%s1513_s3] ss:$0 sm:$0xff]  ;;  %s1263_s3 = smov 32   ;;  %v29_v48 = vld [vmem:[%s1512_s0 + $0x28] sm:$0xff]  ;;  %v30_v49 = vld [vmem:[%s1512_s0 + $0x30] sm:$0xff] }
   0x5   :  { %1118 = vmatpush3.msra.mxu1 %v1321_v5  ;;  %1137 = vmatprep.subr.mxu0 %v1260_v0  ;;  %v28_v47 = vld [vmem:[%s1512_s0 + $0x20] sm:$0xff]  ;;  %v31_v50 = vld [vmem:[%s1512_s0 + $0x38] sm:$0xff] }
   0x6   :  { %1119 = vmatprep.subr.mxu1 %v1260_v0  ;;  %1138 = vmatpush3.msra.mxu0 %v1307_v2 }
   0x7   :  { %1120 = vmatpush3.msra.mxu1 %v1329_v6  ;;  %1139 = vmatprep.subr.mxu0 %v1260_v0 }
   0x8   :  { %1121 = vmatprep.subr.mxu1 %v1260_v0  ;;  %1140 = vmatpush3.msra.mxu0 %v1321_v5 }
   0x9   :  { %1122 = vmatpush3.msra.mxu1 %v1337_v7  ;;  %1141 = vmatprep.subr.mxu0 %v1260_v0 }
   0xa   :  { %1124 = vmatmul.mubr.f32.vlgmr.msra.gmra.mxu1 %v1260_v0  ;;  %1126 = vmatprep.subr.mxu1 %v1260_v0 }
   0xb   :  { %1127 = vmatpush3.msra.mxu1 %v1307_v2  ;;  %1134 = vmatprep.mubr.msk.f32.mxu1 %vm1261_vm2, %v1260_v0 }
   0xc   :  { %1128 = vmatprep.subr.mxu1 %v1260_v0  ;;  %1142 = vmatpush3.msra.mxu0 %v1329_v6 }
   0xd   :  { %1129 = vmatpush3.msra.mxu1 %v1321_v5  ;;  %1143 = vmatprep.subr.mxu0 %v1260_v0 }
   0xe   :  { %1130 = vmatprep.subr.mxu1 %v1260_v0  ;;  %1144 = vmatpush3.msra.mxu0 %v1337_v7 }
   0xf   :  { %1131 = vmatpush3.msra.mxu1 %v1329_v6  ;;  %1159 = vmatprep.subr.mxu0 %v1260_v0 }
  0x10   :  { %1132 = vmatprep.subr.mxu1 %v1260_v0  ;;  %1106 = vmatprep.mubr.msk.f32.mxu0 %vm40_vm1, %v26_v45 }
  0x11   :  { %1133 = vmatpush3.msra.mxu1 %v1337_v7  ;;  %1107 = vmatmul.mubr.msk.f32.gmra.mxu0 %vm40_vm1, %v27_v46 }
  0x12   :  { %1148 = vmatprep.subr.mxu1 %v1260_v0  ;;  %1109 = vmatprep.mubr.msk.f32.mxu0 %vm40_vm1, %v28_v47 }
  0x15   :  { %1110 = vmatmul.mubr.msk.f32.gmra.mxu0 %vm40_vm1, %v29_v48 }
  0x16   :  { %1112 = vmatprep.mubr.msk.f32.mxu0 %vm40_vm1, %v30_v49 }
  0x19   :  { %1113 = vmatmul.mubr.msk.f32.gmra.mxu0 %vm40_vm1, %v31_v50 }
  0x1a   :  { %1145 = vmatprep.mubr.msk.f32.mxu0 %vm1261_vm2, %v1260_v0 }
  0xc4   :  { %v1105_v8 = vpop.f32.mrf.mxu0 }
  0xc5   :  { %v141_v30 = vadd.f32 %v1105_v8, %v1365_v9 }
  0xc6   :  { %v135_v10 = vpop.f32.mrf.mxu0 }
  0xc7   :  { %v136_v11 = vadd.f32 %v1365_v9, %v135_v10 }
  0xca   :  { %v248_v12 = vpop.f32.mrf.mxu1 }
  0xcb   :  { %v252_v13 = vadd.f32 %v248_v12, %v136_v11 }
  0xcc   :  { %v1125_v14 = vpop.f32.mrf.mxu1 }
  0xcd   :  { %v1027_v15 = vmul.f32 -1.442695, %v252_v13 }
  0xcf   :  { %1208 = vpow2.f32 %v1027_v15 }
  0xd1   :  { %v1108_v55 = vpop.f32.mrf.mxu0 }
  0xd3   :  { %v145_v56 = vpop.f32.mrf.mxu0 }
  0xd4   :  { %v146_v61 = vadd.f32 %v1365_v9, %v145_v56 }
  0xd5   :  { %v1425_v57 = vpop.f32.mrf.mxu0 }
  0xd7   :  { %v1427_v58 = vpop.f32.mrf.mxu0 }
  0xd9   :  { %v1429_v59 = vpop.f32.mrf.mxu0 }
  0xdb   :  { %v1431_v60 = vpop.f32.mrf.mxu0 }
  0xdc   :  { %v1209_v16 = vpop.eup %1208 }
  0xdd   :  { %v256_v17 = vadd.f32 1.0, %v1209_v16 }
  0xdf   :  { %1210 = vrcp.f32 %v256_v17 }
  0xec   :  { %v1211_v18 = vpop.eup %1210 }
  0xed   :  { %v259_v19 = vmul.f32 2.0, %v1211_v18  ;;  %v261_v23 = vmul.f32 0.0, %v1211_v18 }
  0xef   :  { %v1028_v20 = vadd.f32 -1.0, %v259_v19 }
  0xf1   :  { %263 = vrot.lane.b32.xlu0 %v1028_v20, %s1262_s11 }
 0x163   :  { %v264_v21 = vpop.permute.xlu0 %263 }
 0x164   :  { %v266_v22 = vmul.f32 %v1211_v18, %v264_v21 }
 0x166   :  { %268 = vrot.lane.b32.xlu0 %v266_v22, %s1263_s3  ;;  %v151_v22 = vadd.f32 %v1108_v55, %v1365_v9 }
 0x1d8   :  { %v269_v24 = vpop.permute.xlu0 %268 }
 0x1d9   :  { %v271_v25 = vadd.f32 %v269_v24, %v261_v23 }
 0x1db   :  { %1212 = vtanh.f32 %v271_v25 }
 0x1e8   :  { %v1213_v26 = vpop.eup %1212 }
 0x1e9   :  { %274 = vrot.lane.b32.xlu1 %v1213_v26, %s1262_s11 }
 0x25b   :  { %v275_v27 = vpop.permute.xlu1 %274 }
 0x25c   :  { %v277_v28 = vmul.f32 %v1211_v18, %v275_v27 }
 0x25e   :  { %279 = vrot.lane.b32.xlu1 %v277_v28, %s1263_s3 }
 0x2d0   :  { %v280_v29 = vpop.permute.xlu1 %279 }
 0x2d1   :  { %1135 = vmatmul.mubr.msk.f32.vlgmr.msra.gmra.mxu1 %vm178_vm3, %v280_v29 }
 0x2d2   :  { %1149 = vmatpush3.msra.mxu1 %v1307_v2  ;;  %1156 = vmatprep.mubr.msk.f32.mxu1 %vm1261_vm2, %v1260_v0 }
 0x2d3   :  { %1150 = vmatprep.subr.mxu1 %v1260_v0 }
 0x2d4   :  { %1151 = vmatpush3.msra.mxu1 %v1321_v5 }
 0x2d5   :  { %1152 = vmatprep.subr.mxu1 %v1260_v0 }
 0x2d6   :  { %1153 = vmatpush3.msra.mxu1 %v1329_v6 }
 0x2d7   :  { %1154 = vmatprep.subr.mxu1 %v1260_v0 }
 0x2d8   :  { %1155 = vmatpush3.msra.mxu1 %v1337_v7 }
 0x2d9   :  { %1170 = vmatprep.subr.mxu1 %v1260_v0 }
 0x391   :  { %v349_v31 = vpop.f32.mrf.mxu1 }
 0x392   :  { %v353_v32 = vadd.f32 %v349_v31, %v141_v30 }
 0x393   :  { %v1136_v33 = vpop.f32.mrf.mxu1 }
 0x394   :  { %v1030_v34 = vmul.f32 -1.442695, %v353_v32 }
 0x396   :  { %1214 = vpow2.f32 %v1030_v34 }
 0x3a3   :  { %v1215_v35 = vpop.eup %1214 }
 0x3a4   :  { %v357_v36 = vadd.f32 1.0, %v1215_v35 }
 0x3a6   :  { %1216 = vrcp.f32 %v357_v36 }
 0x3b3   :  { %v1217_v37 = vpop.eup %1216 }
 0x3b4   :  { %v360_v38 = vmul.f32 2.0, %v1217_v37  ;;  %v362_v42 = vmul.f32 %v1217_v37, %v271_v25 }
 0x3b6   :  { %v1031_v39 = vadd.f32 -1.0, %v360_v38 }
 0x3b8   :  { %364 = vrot.lane.b32.xlu0 %v1031_v39, %s1262_s11 }
 0x42a   :  { %v365_v40 = vpop.permute.xlu0 %364 }
 0x42b   :  { %v367_v41 = vmul.f32 %v1217_v37, %v365_v40 }
 0x42d   :  { %369 = vrot.lane.b32.xlu1 %v367_v41, %s1263_s3  ;;  %v156_v41 = vadd.f32 %v1365_v9, %v1427_v58 }
 0x49f   :  { %v370_v43 = vpop.permute.xlu1 %369 }
 0x4a0   :  { %v372_v44 = vadd.f32 %v370_v43, %v362_v42 }
 0x4a2   :  { %1218 = vtanh.f32 %v372_v44 }
 0x4af   :  { %v1219_v51 = vpop.eup %1218 }
 0x4b0   :  { %375 = vrot.lane.b32.xlu0 %v1219_v51, %s1262_s11 }
 0x522   :  { %v376_v52 = vpop.permute.xlu0 %375 }
 0x523   :  { %v378_v53 = vmul.f32 %v1217_v37, %v376_v52 }
 0x525   :  { %380 = vrot.lane.b32.xlu1 %v378_v53, %s1263_s3 }
 0x597   :  { %v381_v54 = vpop.permute.xlu1 %380 }
 0x598   :  { %1146 = vmatmul.mubr.msk.f32.vlgmr.msra.gmra.mxu0 %vm178_vm3, %v381_v54 }
 0x599   :  { %1160 = vmatpush3.msra.mxu0 %v1307_v2  ;;  %1167 = vmatprep.mubr.msk.f32.mxu0 %vm1261_vm2, %v1260_v0 }
 0x59a   :  { %1161 = vmatprep.subr.mxu0 %v1260_v0 }
 0x59b   :  { %1162 = vmatpush3.msra.mxu0 %v1321_v5 }
 0x59c   :  { %1163 = vmatprep.subr.mxu0 %v1260_v0 }
 0x59d   :  { %1164 = vmatpush3.msra.mxu0 %v1329_v6 }
 0x59e   :  { %1165 = vmatprep.subr.mxu0 %v1260_v0 }
 0x59f   :  { %1166 = vmatpush3.msra.mxu0 %v1337_v7 }
 0x5a0   :  { %1181 = vmatprep.subr.mxu0 %v1260_v0 }
 0x658   :  { %v450_v62 = vpop.f32.mrf.mxu0 }
 0x659   :  { %v454_v63 = vadd.f32 %v450_v62, %v146_v61 }
 0x65a   :  { %v1147_v1 = vpop.f32.mrf.mxu0 }
 0x65b   :  { %v1033_v3 = vmul.f32 -1.442695, %v454_v63  ;;  %v161_v63 = vadd.f32 %v1425_v57, %v1365_v9 }
 0x65d   :  { %1220 = vpow2.f32 %v1033_v3 }
 0x66a   :  { %v1221_v4 = vpop.eup %1220 }
 0x66b   :  { %v458_v8 = vadd.f32 1.0, %v1221_v4 }
 0x66d   :  { %1222 = vrcp.f32 %v458_v8 }
 0x67a   :  { %v1223_v10 = vpop.eup %1222 }
 0x67b   :  { %v461_v11 = vmul.f32 2.0, %v1223_v10  ;;  %v463_v15 = vmul.f32 %v1223_v10, %v372_v44 }
 0x67d   :  { %v1034_v12 = vadd.f32 -1.0, %v461_v11 }
 0x67f   :  { %465 = vrot.lane.b32.xlu0 %v1034_v12, %s1262_s11 }
 0x6f1   :  { %v466_v13 = vpop.permute.xlu0 %465 }
 0x6f2   :  { %v468_v14 = vmul.f32 %v1223_v10, %v466_v13 }
 0x6f4   :  { %470 = vrot.lane.b32.xlu1 %v468_v14, %s1263_s3 }
 0x766   :  { %v471_v16 = vpop.permute.xlu1 %470 }
 0x767   :  { %v473_v17 = vadd.f32 %v471_v16, %v463_v15 }
 0x769   :  { %1224 = vtanh.f32 %v473_v17 }
 0x776   :  { %v1225_v18 = vpop.eup %1224 }
 0x777   :  { %476 = vrot.lane.b32.xlu0 %v1225_v18, %s1262_s11  ;;  %v166_v18 = vadd.f32 %v1365_v9, %v1431_v60 }
 0x7e9   :  { %v477_v19 = vpop.permute.xlu0 %476 }
 0x7ea   :  { %v479_v20 = vmul.f32 %v1223_v10, %v477_v19 }
 0x7ec   :  { %481 = vrot.lane.b32.xlu1 %v479_v20, %s1263_s3 }
 0x85e   :  { %v482_v21 = vpop.permute.xlu1 %481 }
 0x85f   :  { %1157 = vmatmul.mubr.msk.f32.vlgmr.msra.gmra.mxu1 %vm178_vm3, %v482_v21 }
 0x860   :  { %1171 = vmatpush3.msra.mxu1 %v1307_v2  ;;  %1178 = vmatprep.mubr.msk.f32.mxu1 %vm1261_vm2, %v1260_v0 }
 0x861   :  { %1172 = vmatprep.subr.mxu1 %v1260_v0 }
 0x862   :  { %1173 = vmatpush3.msra.mxu1 %v1321_v5 }
 0x863   :  { %1174 = vmatprep.subr.mxu1 %v1260_v0 }
 0x864   :  { %1175 = vmatpush3.msra.mxu1 %v1329_v6 }
 0x865   :  { %1176 = vmatprep.subr.mxu1 %v1260_v0 }
 0x866   :  { %1177 = vmatpush3.msra.mxu1 %v1337_v7 }
 0x867   :  { %1192 = vmatprep.subr.mxu1 %v1260_v0 }
 0x91f   :  { %v551_v23 = vpop.f32.mrf.mxu1 }
 0x920   :  { %v555_v24 = vadd.f32 %v551_v23, %v151_v22 }
 0x921   :  { %v1158_v25 = vpop.f32.mrf.mxu1 }
 0x922   :  { %v1036_v26 = vmul.f32 -1.442695, %v555_v24 }
 0x924   :  { %1226 = vpow2.f32 %v1036_v26 }
 0x931   :  { %v1227_v27 = vpop.eup %1226 }
 0x932   :  { %v559_v28 = vadd.f32 1.0, %v1227_v27 }
 0x934   :  { %1228 = vrcp.f32 %v559_v28 }
 0x941   :  { %v1229_v29 = vpop.eup %1228 }
 0x942   :  { %v562_v30 = vmul.f32 2.0, %v1229_v29  ;;  %v564_v34 = vmul.f32 %v1229_v29, %v473_v17 }
 0x944   :  { %v1037_v31 = vadd.f32 -1.0, %v562_v30 }
 0x946   :  { %566 = vrot.lane.b32.xlu0 %v1037_v31, %s1262_s11 }
 0x9b8   :  { %v567_v32 = vpop.permute.xlu0 %566 }
 0x9b9   :  { %v569_v33 = vmul.f32 %v1229_v29, %v567_v32 }
 0x9bb   :  { %571 = vrot.lane.b32.xlu1 %v569_v33, %s1263_s3 }
 0xa2d   :  { %v572_v35 = vpop.permute.xlu1 %571 }
 0xa2e   :  { %v574_v36 = vadd.f32 %v572_v35, %v564_v34 }
 0xa30   :  { %1230 = vtanh.f32 %v574_v36 }
 0xa3d   :  { %v1231_v37 = vpop.eup %1230 }
 0xa3e   :  { %577 = vrot.lane.b32.xlu0 %v1231_v37, %s1262_s11 }
 0xab0   :  { %v578_v38 = vpop.permute.xlu0 %577 }
 0xab1   :  { %v580_v39 = vmul.f32 %v1229_v29, %v578_v38 }
 0xab3   :  { %582 = vrot.lane.b32.xlu1 %v580_v39, %s1263_s3 }
 0xb25   :  { %v583_v40 = vpop.permute.xlu1 %582 }
 0xb26   :  { %1168 = vmatmul.mubr.msk.f32.vlgmr.msra.gmra.mxu0 %vm178_vm3, %v583_v40 }
 0xb27   :  { %1182 = vmatpush3.msra.mxu0 %v1307_v2  ;;  %1189 = vmatprep.mubr.msk.f32.mxu0 %vm1261_vm2, %v1260_v0 }
 0xb28   :  { %1183 = vmatprep.subr.mxu0 %v1260_v0 }
 0xb29   :  { %1184 = vmatpush3.msra.mxu0 %v1321_v5 }
 0xb2a   :  { %1185 = vmatprep.subr.mxu0 %v1260_v0 }
 0xb2b   :  { %1186 = vmatpush3.msra.mxu0 %v1329_v6 }
 0xb2c   :  { %1187 = vmatprep.subr.mxu0 %v1260_v0 }
 0xb2d   :  { %1188 = vmatpush3.msra.mxu0 %v1337_v7 }
 0xbe6   :  { %v652_v42 = vpop.f32.mrf.mxu0 }
 0xbe7   :  { %v656_v43 = vadd.f32 %v652_v42, %v156_v41 }
 0xbe8   :  { %v1169_v44 = vpop.f32.mrf.mxu0 }
 0xbe9   :  { %v1039_v45 = vmul.f32 -1.442695, %v656_v43 }
 0xbeb   :  { %1232 = vpow2.f32 %v1039_v45 }
 0xbf8   :  { %v1233_v46 = vpop.eup %1232 }
 0xbf9   :  { %v660_v47 = vadd.f32 1.0, %v1233_v46 }
 0xbfb   :  { %1234 = vrcp.f32 %v660_v47 }
 0xc08   :  { %v1235_v48 = vpop.eup %1234 }
 0xc09   :  { %v663_v49 = vmul.f32 2.0, %v1235_v48  ;;  %v665_v53 = vmul.f32 %v1235_v48, %v574_v36  ;;  %v171_v36 = vadd.f32 %v1429_v59, %v1365_v9  ;;  %v1050_v9 = vld [vmem:[%s1514_s4] ss:$0 sm:$0xff] }
 0xc0b   :  { %v1040_v50 = vadd.f32 -1.0, %v663_v49 }
 0xc0d   :  { %667 = vrot.lane.b32.xlu0 %v1040_v50, %s1262_s11 }
 0xc7f   :  { %v668_v51 = vpop.permute.xlu0 %667 }
 0xc80   :  { %v670_v52 = vmul.f32 %v1235_v48, %v668_v51 }
 0xc82   :  { %672 = vrot.lane.b32.xlu1 %v670_v52, %s1263_s3 }
 0xcf4   :  { %v673_v54 = vpop.permute.xlu1 %672 }
 0xcf5   :  { %v675_v55 = vadd.f32 %v673_v54, %v665_v53 }
 0xcf7   :  { %1236 = vtanh.f32 %v675_v55 }
 0xd04   :  { %v1237_v56 = vpop.eup %1236 }
 0xd05   :  { %678 = vrot.lane.b32.xlu0 %v1237_v56, %s1262_s11 }
 0xd77   :  { %v679_v58 = vpop.permute.xlu0 %678 }
 0xd78   :  { %v681_v61 = vmul.f32 %v1235_v48, %v679_v58  ;;  %v1003_v58 = vstv %s1515_s5 }
 0xd7a   :  { %683 = vrot.lane.b32.xlu1 %v681_v61, %s1263_s3 }
 0xdec   :  { %v684_v62 = vpop.permute.xlu1 %683 }
 0xded   :  { %1179 = vmatmul.mubr.msk.f32.vlgmr.msra.gmra.mxu1 %vm178_vm3, %v684_v62 }
 0xdee   :  { %1193 = vmatpush3.msra.mxu1 %v1307_v2  ;;  %1200 = vmatprep.mubr.msk.f32.mxu1 %vm1261_vm2, %v1260_v0 }
 0xdef   :  { %1194 = vmatprep.subr.mxu1 %v1260_v0 }
 0xdf0   :  { %1195 = vmatpush3.msra.mxu1 %v1321_v5 }
 0xdf1   :  { %1196 = vmatprep.subr.mxu1 %v1260_v0 }
 0xdf2   :  { %1197 = vmatpush3.msra.mxu1 %v1329_v6 }
 0xdf3   :  { %1198 = vmatprep.subr.mxu1 %v1260_v0 }
 0xdf4   :  { %1199 = vmatpush3.msra.mxu1 %v1337_v7 }
 0xead   :  { %v753_v1 = vpop.f32.mrf.mxu1 }
 0xeae   :  { %v757_v2 = vadd.f32 %v753_v1, %v161_v63 }
 0xeaf   :  { %v1180_v3 = vpop.f32.mrf.mxu1 }
 0xeb0   :  { %v1042_v4 = vmul.f32 -1.442695, %v757_v2 }
 0xeb2   :  { %1238 = vpow2.f32 %v1042_v4 }
 0xebf   :  { %v1239_v8 = vpop.eup %1238 }
 0xec0   :  { %v761_v10 = vadd.f32 1.0, %v1239_v8 }
 0xec2   :  { %1240 = vrcp.f32 %v761_v10 }
 0xecf   :  { %v1241_v5 = vpop.eup %1240 }
 0xed0   :  { %v764_v11 = vmul.f32 2.0, %v1241_v5  ;;  %v766_v7 = vmul.f32 %v1241_v5, %v675_v55 }
 0xed2   :  { %v1043_v12 = vadd.f32 -1.0, %v764_v11 }
 0xed4   :  { %768 = vrot.lane.b32.xlu0 %v1043_v12, %s1262_s11 }
 0xf46   :  { %v769_v6 = vpop.permute.xlu0 %768 }
 0xf47   :  { %v771_v0 = vmul.f32 %v1241_v5, %v769_v6 }
 0xf49   :  { %773 = vrot.lane.b32.xlu1 %v771_v0, %s1263_s3 }
 0xfbb   :  { %v774_v13 = vpop.permute.xlu1 %773 }
 0xfbc   :  { %v776_v57 = vadd.f32 %v774_v13, %v766_v7 }
 0xfbe   :  { %1242 = vtanh.f32 %v776_v57 }
 0xfcb   :  { %v1243_v14 = vpop.eup %1242 }
 0xfcc   :  { %779 = vrot.lane.b32.xlu0 %v1243_v14, %s1262_s11 }
0x103e   :  { %v780_v15 = vpop.permute.xlu0 %779 }
0x103f   :  { %v782_v16 = vmul.f32 %v1241_v5, %v780_v15 }
0x1041   :  { %784 = vrot.lane.b32.xlu1 %v782_v16, %s1263_s3 }
0x10b3   :  { %v785_v17 = vpop.permute.xlu1 %784 }
0x10b4   :  { %1190 = vmatmul.mubr.msk.f32.vlgmr.msra.gmra.mxu0 %vm178_vm3, %v785_v17 }
0x1174   :  { %v854_v19 = vpop.f32.mrf.mxu0 }
0x1175   :  { %v858_v20 = vadd.f32 %v854_v19, %v166_v18 }
0x1176   :  { %v1191_v21 = vpop.f32.mrf.mxu0 }
0x1177   :  { %v1045_v22 = vmul.f32 -1.442695, %v858_v20 }
0x1179   :  { %1244 = vpow2.f32 %v1045_v22 }
0x1186   :  { %v1245_v23 = vpop.eup %1244 }
0x1187   :  { %v862_v24 = vadd.f32 1.0, %v1245_v23 }
0x1189   :  { %1246 = vrcp.f32 %v862_v24 }
0x1196   :  { %v1247_v25 = vpop.eup %1246 }
0x1197   :  { %v865_v26 = vmul.f32 2.0, %v1247_v25  ;;  %v867_v30 = vmul.f32 %v1247_v25, %v776_v57 }
0x1199   :  { %v1046_v27 = vadd.f32 -1.0, %v865_v26 }
0x119b   :  { %869 = vrot.lane.b32.xlu0 %v1046_v27, %s1262_s11 }
0x120d   :  { %v870_v28 = vpop.permute.xlu0 %869 }
0x120e   :  { %v872_v29 = vmul.f32 %v1247_v25, %v870_v28 }
0x1210   :  { %874 = vrot.lane.b32.xlu1 %v872_v29, %s1263_s3 }
0x1282   :  { %v875_v31 = vpop.permute.xlu1 %874 }
0x1283   :  { %v877_v60 = vadd.f32 %v875_v31, %v867_v30 }
0x1285   :  { %1248 = vtanh.f32 %v877_v60 }
0x1292   :  { %v1249_v32 = vpop.eup %1248 }
0x1293   :  { %880 = vrot.lane.b32.xlu0 %v1249_v32, %s1262_s11 }
0x1305   :  { %v881_v33 = vpop.permute.xlu0 %880 }
0x1306   :  { %v883_v34 = vmul.f32 %v1247_v25, %v881_v33 }
0x1308   :  { %885 = vrot.lane.b32.xlu1 %v883_v34, %s1263_s3 }
0x137a   :  { %v886_v35 = vpop.permute.xlu1 %885 }
0x137b   :  { %1201 = vmatmul.mubr.msk.f32.vlgmr.msra.gmra.mxu1 %vm178_vm3, %v886_v35 }
0x143b   :  { %v955_v37 = vpop.f32.mrf.mxu1 }
0x143c   :  { %v959_v38 = vadd.f32 %v955_v37, %v171_v36 }
0x143d   :  { %v1202_v39 = vpop.f32.mrf.mxu1 }
0x143e   :  { %v1048_v40 = vmul.f32 -1.442695, %v959_v38 }
0x1440   :  { %1250 = vpow2.f32 %v1048_v40 }
0x144d   :  { %v1251_v41 = vpop.eup %1250 }
0x144e   :  { %v963_v42 = vadd.f32 1.0, %v1251_v41 }
0x1450   :  { %1252 = vrcp.f32 %v963_v42 }
0x145d   :  { %v1253_v43 = vpop.eup %1252 }
0x145e   :  { %v966_v44 = vmul.f32 2.0, %v1253_v43  ;;  %v968_v59 = vmul.f32 %v1253_v43, %v877_v60 }
0x1460   :  { %v1049_v45 = vadd.f32 -1.0, %v966_v44 }
0x1462   :  { %970 = vrot.lane.b32.xlu0 %v1049_v45, %s1262_s11 }
0x14d4   :  { %v971_v46 = vpop.permute.xlu0 %970 }
0x14d5   :  { %v973_v47 = vmul.f32 %v1253_v43, %v971_v46 }
0x14d7   :  { %975 = vrot.lane.b32.xlu1 %v973_v47, %s1263_s3 }
0x14db   :  { %991 = vrot.lane.b32.xlu1 %v1050_v9, %s1264_s25 }
0x1549   :  { %v976_v48 = vpop.permute.xlu1 %975 }
0x154a   :  { %v978_v49 = vadd.f32 %v976_v48, %v968_v59 }
0x154c   :  { %1254 = vtanh.f32 %v978_v49 }
0x154d   :  { %v992_v52 = vpop.permute.xlu1 %991 }
0x1559   :  { %v1255_v50 = vpop.eup %1254 }
0x155a   :  { %981 = vrot.lane.b32.xlu0 %v1255_v50, %s1262_s11 }
0x15cc   :  { %v982_v51 = vpop.permute.xlu0 %981 }
0x15cd   :  { %v984_v53 = vmul.f32 %v1253_v43, %v982_v51 }
0x15cf   :  { %v994_v54 = vmul.f32 %v992_v52, %v984_v53 }
0x15d1   :  { %996 = vrot.lane.b32.xlu0 %v994_v54, %s1263_s3 }
0x1643   :  { %v997_v55 = vpop.permute.xlu0 %996 }
0x1644   :  { %v999_v56 = vsel %vm178_vm3, %v997_v55, 0.0 }
0x1645   :  { %1000 = vadd.xlane.f32.xlu1 %v999_v56 }
0x16ce   :  { %v1001_v61 = vpop.xlane.xlu1 %1000 }
0x16cf   :  { %v1004_v62 = vadd.f32 %v1003_v58, %v1001_v61 }
0x16d1   :  { %v1051_v63 = vmul.f32 -1.442695, %v1004_v62 }
0x16d3   :  { %1256 = vpow2.f32 %v1051_v63 }
0x16e0   :  { %v1257_v1 = vpop.eup %1256 }
0x16e1   :  { %v1008_v2 = vadd.f32 1.0, %v1257_v1 }
0x16e3   :  { %1258 = vrcp.f32 %v1008_v2 }
0x16f0   :  { %v1259_v3 = vpop.eup %1258 }
0x16f1   :  { %1012 = vst.msk [vmem:[%s1516_s6] sm:$0xff] %vm1011_vm4, %v1259_v3 }

</bundles_post_ra>
